<compile_context>
chip_gen: v6e
topology: v6e:2x2x1
jax: 0.10.0
libtpu: 0.0.40
codegen_flags: <defaults>
</compile_context>

<pallas_src>
import functools

import numpy as np
import jax
import jax.numpy as jnp
from jax.experimental import pallas as pl
from jax.experimental.pallas import tpu as pltpu


# ----------------------------------------------------------------------------
# Fused conv(+BN-folded)+bias(+residual)(+ReLU) kernel.
#   x_ref : (1, Lx, cin)      bf16  flattened padded image rows (+1 overhang row for k>1)
#   w_ref : (k, k*cin, tn)    bf16  (BN scale already folded in; [dy][dx*cin] layout)
#   b_ref : (1, tn)           f32
#   res   : (1, m, tn)        bf16  (optional, fused skip connection)
#   out   : (1, m, tn)        bf16, m = Ho*Wp (full padded width; garbage cols cropped outside)
# ----------------------------------------------------------------------------
def _build_conv_kernel(k, cin, Wp, m, fuse_dx, has_residual, apply_relu):
    def kernel(x_ref, w_ref, b_ref, *rest):
        if has_residual:
            res_ref, o_ref = rest
        else:
            (o_ref,) = rest
        acc = None
        for dy in range(k):
            base = dy * Wp
            if k == 1:
                d = jnp.dot(x_ref[0], w_ref[0], preferred_element_type=jnp.float32)
            elif fuse_dx:
                # fuse the k horizontal taps along K: one deep dot per kernel row
                lhs = jnp.concatenate(
                    [x_ref[0, base + dx:base + dx + m, :] for dx in range(k)], axis=-1)
                d = jnp.dot(lhs, w_ref[dy], preferred_element_type=jnp.float32)
            else:
                d = None
                for dx in range(k):
                    dd = jnp.dot(x_ref[0, base + dx:base + dx + m, :],
                                 w_ref[dy, dx * cin:(dx + 1) * cin, :],
                                 preferred_element_type=jnp.float32)
                    d = dd if d is None else d + dd
            acc = d if acc is None else acc + d
        acc = acc + b_ref[...]                       # folded-BN bias (f32)
        if has_residual:
            acc = acc + res_ref[0].astype(jnp.float32)   # fused skip connection
        if apply_relu:
            acc = jnp.maximum(acc, 0.0)
        o_ref[0] = acc.astype(o_ref.dtype)           # single cast on the final store (bf16)
    return kernel


@functools.lru_cache(maxsize=None)
def _conv_call(N, Lx, cin, cout, tn, k, Wp, Ho, has_residual, relu, batch_inner):
    m = Ho * Wp
    fuse_dx = (k > 1) and (cin % 128 == 0)
    kernel = _build_conv_kernel(k, cin, Wp, m, fuse_dx, has_residual, relu)

    if batch_inner:
        # batch fastest: weight tile DMA'd once, reused across the batch
        grid = (cout // tn, N)
        act_map = lambda j, i: (i, 0, 0)
        w_map = lambda j, i: (0, 0, j)
        b_map = lambda j, i: (0, j)
        o_map = lambda j, i: (i, 0, j)
    else:
        # cout fastest: activation block DMA'd once per image, reused across cout tiles
        grid = (N, cout // tn)
        act_map = lambda i, j: (i, 0, 0)
        w_map = lambda i, j: (0, 0, j)
        b_map = lambda i, j: (0, j)
        o_map = lambda i, j: (i, 0, j)

    in_specs = [
        pl.BlockSpec((1, Lx, cin), act_map),        # activation (whole image, bf16)
        pl.BlockSpec((k, k * cin, tn), w_map),      # weight tile (bf16)
        pl.BlockSpec((1, tn), b_map),               # bias tile (f32)
    ]
    if has_residual:
        in_specs.append(pl.BlockSpec((1, m, tn), o_map))

    fn = pl.pallas_call(
        kernel,
        out_shape=jax.ShapeDtypeStruct((N, m, cout), jnp.bfloat16),
        grid=grid,
        in_specs=in_specs,
        out_specs=pl.BlockSpec((1, m, tn), o_map),
        compiler_params=pltpu.CompilerParams(
            dimension_semantics=("parallel", "parallel")),
    )
    return jax.jit(fn)


def conv_bn_act(x, cp, pad, stride=1, residual=None, relu=True):
    """x: (N,H,W,cin) bf16.  cp: {'w': (k,k*cin,cout) bf16 (BN folded), 'b': (1,cout) f32}."""
    k, kcin, cout = cp["w"].shape
    cin = kcin // k
    N, H, W, _ = x.shape
    Hp, Wp = H + 2 * pad, W + 2 * pad
    Ho, Wo = Hp - k + 1, Wp - k + 1
    if k > 1:
        # single pad: spatial zero-pad + ONE extra bottom row so the last tap's flat slice
        # never runs past the buffer (only discarded garbage columns ever read that row)
        x = jnp.pad(x, ((0, 0), (pad, pad + 1), (pad, pad), (0, 0)))
    Lx = x.shape[1] * x.shape[2]
    xf = x.reshape(N, Lx, cin)            # row-major merge -> free reshape, no HBM copy

    if cout % 128:
        tn = cout                         # 64-channel layers (stem / layer1 reductions)
    elif k == 1:
        tn = min(cout, 512)               # deep 1x1 layers: wider tile, fewer passes
    else:
        tn = min(cout, 256)

    res = None
    if residual is not None:
        assert k == 1 and pad == 0 and stride == 1   # skip only fused into 1x1 s1 convs
        res = residual.reshape(N, Ho * Wo, cout)     # bf16, no cast

    # pick grid order: keep whichever operand is more expensive to re-fetch resident in VMEM
    cout_tiles = cout // tn
    act_bytes = Lx * cin * 2
    w_bytes = k * kcin * cout * 2
    batch_inner = N * act_bytes * (cout_tiles - 1) <= w_bytes * (N - 1)

    fn = _conv_call(N, Lx, cin, cout, tn, k, Wp, Ho, residual is not None, relu,
                    bool(batch_inner))
    out = fn(xf, cp["w"], cp["b"]) if res is None else fn(xf, cp["w"], cp["b"], res)

    out = out.reshape(N, Ho, Wp, cout)
    if Wo != Wp or stride > 1:
        # TODO(synk): true strided-conv lowering; stride-2 is stride-1 + subsample (exact).
        out = out[:, ::stride, :Wo:stride, :]   # crop garbage cols + stride in ONE slice op
    return out


# ----------------------------------------------------------------------------
# MaxPool 3x3 / stride 2 / pad 1  (stride-1 max in Pallas, subsample in JAX glue)
# ----------------------------------------------------------------------------
@functools.lru_cache(maxsize=None)
def _maxpool_call(N, Lx, Wp, Ho, C):
    m = Ho * Wp
    offsets = tuple(dy * Wp + dx for dy in range(3) for dx in range(3))

    def kernel(x_ref, o_ref):
        r = x_ref[0, offsets[0]:offsets[0] + m, :]
        for off in offsets[1:]:
            r = jnp.maximum(r, x_ref[0, off:off + m, :])
        o_ref[0] = r

    fn = pl.pallas_call(
        kernel,
        out_shape=jax.ShapeDtypeStruct((N, m, C), jnp.bfloat16),
        grid=(N,),
        in_specs=[pl.BlockSpec((1, Lx, C), lambda i: (i, 0, 0))],
        out_specs=pl.BlockSpec((1, m, C), lambda i: (i, 0, 0)),
        compiler_params=pltpu.CompilerParams(dimension_semantics=("parallel",)),
    )
    return jax.jit(fn)


def maxpool_3x3_s2_p1(x):
    N, H, W, C = x.shape
    # pad with the most-negative bf16 (input is post-ReLU, so this behaves like -inf padding);
    # one extra bottom row folded into the same pad covers the flat-slice overhang
    neg = float(jnp.finfo(jnp.bfloat16).min)
    xp = jnp.pad(x, ((0, 0), (1, 2), (1, 1), (0, 0)), constant_values=neg)
    Wp, Ho, Wo = W + 2, H, W
    xf = xp.reshape(N, xp.shape[1] * Wp, C)
    out = _maxpool_call(N, xf.shape[1], Wp, Ho, C)(xf)
    out = out.reshape(N, Ho, Wp, C)
    return out[:, ::2, :Wo:2, :]


# ----------------------------------------------------------------------------
# Fused global-average-pool + FC head (one Pallas kernel, one launch)
# ----------------------------------------------------------------------------
@functools.lru_cache(maxsize=None)
def _pool_fc_call(N, HW, C, ncls):
    def kernel(x_ref, w_ref, b_ref, o_ref):
        pooled = jnp.mean(x_ref[...].astype(jnp.float32), axis=1)        # (N, C) f32
        acc = jnp.dot(pooled.astype(jnp.bfloat16), w_ref[...],
                      preferred_element_type=jnp.float32)
        o_ref[...] = acc + b_ref[...]

    fn = pl.pallas_call(kernel, out_shape=jax.ShapeDtypeStruct((N, ncls), jnp.float32))
    return jax.jit(fn)


# ----------------------------------------------------------------------------
# Parameter init (deterministic; BN folded into weights at prep time; weights bf16,
# layout (k, k*cin, cout) = [dy][dx*cin] so the kernel can K-fuse horizontal taps)
# ----------------------------------------------------------------------------
def _init_conv_bn(key, k, cin, cout, gamma_scale=1.0, eps=1e-5):
    kw_, kg, kb, km, kv = jax.random.split(key, 5)
    w = jax.random.normal(kw_, (k, k, cin, cout), jnp.float32) * float(np.sqrt(2.0 / (k * k * cin)))
    gamma = jax.random.uniform(kg, (cout,), jnp.float32, 0.9, 1.1) * gamma_scale
    beta = 0.05 * jax.random.normal(kb, (cout,), jnp.float32)
    mean = 0.05 * jax.random.normal(km, (cout,), jnp.float32)
    var = jax.random.uniform(kv, (cout,), jnp.float32, 0.9, 1.1)
    scale = gamma * jax.lax.rsqrt(var + eps)
    return {"w": (w * scale).reshape(k, k * cin, cout).astype(jnp.bfloat16),
            "b": (beta - mean * scale).reshape(1, cout).astype(jnp.float32)}


def _init_bottleneck(key, cin, planes, stride, downsample):
    ks = jax.random.split(key, 4)
    p = {"c1": _init_conv_bn(ks[0], 1, cin, planes),
         "c2": _init_conv_bn(ks[1], 3, planes, planes),
         "c3": _init_conv_bn(ks[2], 1, planes, 4 * planes, gamma_scale=0.2),
         "stride": stride}
    if downsample:
        p["ds"] = _init_conv_bn(ks[3], 1, cin, 4 * planes)
    return p


def _init_layer(key, cin, planes, blocks, stride):
    ks = jax.random.split(key, blocks)
    out = [_init_bottleneck(ks[0], cin, planes, stride, True)]
    for i in range(1, blocks):
        out.append(_init_bottleneck(ks[i], 4 * planes, planes, 1, False))
    return out


def init_resnet50(key, input_ch=3, output_ch=10):
    ks = jax.random.split(key, 7)
    return {
        "stem": _init_conv_bn(ks[0], 7, input_ch, 64),               # conv1 7x7 s2 p3 + bn + relu
        "layer1": _init_layer(ks[1], 64, 64, 3, 1),
        "layer2": _init_layer(ks[2], 256, 128, 4, 2),
        "layer3": _init_layer(ks[3], 512, 256, 6, 2),
        "layer4": _init_layer(ks[4], 1024, 512, 3, 2),
        "fc_w": (jax.random.normal(ks[5], (2048, output_ch), jnp.float32)
                 * float(np.sqrt(1.0 / 2048))).astype(jnp.bfloat16),
        "fc_b": 0.01 * jax.random.normal(ks[6], (1, output_ch), jnp.float32),
    }


# ----------------------------------------------------------------------------
# Forward (Pallas)
# ----------------------------------------------------------------------------
def _stem_forward(x, cp):
    # 7x7 stride-2 pad-3 conv on a 3-channel input: lowered via a tiny bf16 JAX im2col to an
    # equivalent 1x1 conv (patch expansion of a 3-channel image is negligible).
    k, kcin, cout = cp["w"].shape
    cin = kcin // k
    pad, stride = 3, 2
    xp = jnp.pad(x, ((0, 0), (pad, pad), (pad, pad), (0, 0)))
    N, Hp, Wp, _ = xp.shape
    Ho = (Hp - k) // stride + 1
    Wo = (Wp - k) // stride + 1
    cols = jnp.concatenate(
        [xp[:, dy:dy + (Ho - 1) * stride + 1:stride, dx:dx + (Wo - 1) * stride + 1:stride, :]
         for dy in range(k) for dx in range(k)], axis=-1)            # (N, Ho, Wo, k*k*cin)
    cp1 = {"w": cp["w"].reshape(1, k * k * cin, cout), "b": cp["b"]}
    return conv_bn_act(cols, cp1, pad=0, relu=True)


def _bottleneck_forward(x, p):
    s = p["stride"]
    h = conv_bn_act(x, p["c1"], pad=0, relu=True)                    # 1x1
    h = conv_bn_act(h, p["c2"], pad=1, stride=s, relu=True)          # 3x3 (maybe strided)
    if "ds" in p:
        xi = x if s == 1 else x[:, ::s, ::s, :]                      # 1x1 s2 == subsample + 1x1
        identity = conv_bn_act(xi, p["ds"], pad=0, relu=False)
    else:
        identity = x
    # final 1x1 conv: bias + residual add + ReLU fused in the kernel epilogue
    return conv_bn_act(h, p["c3"], pad=0, residual=identity, relu=True)


def resnet50_forward(params, x_nchw):
    # activations travel HBM<->VMEM as bf16; accumulation / epilogue stay f32 in-kernel
    x = jnp.transpose(x_nchw, (0, 2, 3, 1)).astype(jnp.bfloat16)     # NCHW -> NHWC
    x = _stem_forward(x, params["stem"])
    x = maxpool_3x3_s2_p1(x)
    for name in ("layer1", "layer2", "layer3", "layer4"):
        for bp in params[name]:
            x = _bottleneck_forward(x, bp)
    N, H, W, C = x.shape
    logits = _pool_fc_call(N, H * W, C, params["fc_b"].shape[1])(
        x.reshape(N, H * W, C), params["fc_w"], params["fc_b"])
    return logits


# ----------------------------------------------------------------------------
# Pure-JAX reference (same math: bf16 operands/intermediates, f32 accumulation)
# ----------------------------------------------------------------------------
def _ref_conv_bn(x, cp, pad, stride=1, residual=None, relu=True):
    k, kcin, cout = cp["w"].shape
    cin = kcin // k
    w4 = cp["w"].reshape(k, k, cin, cout)                            # HWIO, bf16
    out = jax.lax.conv_general_dilated(
        x, w4, (stride, stride), ((pad, pad), (pad, pad)),
        dimension_numbers=("NHWC", "HWIO", "NHWC"),
        preferred_element_type=jnp.float32)
    out = out + cp["b"].reshape(1, 1, 1, cout)
    if residual is not None:
        out = out + residual.astype(jnp.float32)
    if relu:
        out = jnp.maximum(out, 0.0)
    return out.astype(jnp.bfloat16)


def _ref_bottleneck(x, p):
    s = p["stride"]
    h = _ref_conv_bn(x, p["c1"], 0, 1, None, True)
    h = _ref_conv_bn(h, p["c2"], 1, s, None, True)
    identity = _ref_conv_bn(x, p["ds"], 0, s, None, False) if "ds" in p else x
    return _ref_conv_bn(h, p["c3"], 0, 1, identity, True)


def ref_forward(params, x_nchw):
    x = jnp.transpose(x_nchw, (0, 2, 3, 1)).astype(jnp.bfloat16)
    x = _ref_conv_bn(x, params["stem"], 3, 2, None, True)
    x = jax.lax.reduce_window(x, jnp.asarray(-jnp.inf, x.dtype), jax.lax.max,
                              (1, 3, 3, 1), (1, 2, 2, 1),
                              ((0, 0), (1, 1), (1, 1), (0, 0)))
    for name in ("layer1", "layer2", "layer3", "layer4"):
        for bp in params[name]:
            x = _ref_bottleneck(x, bp)
    pooled = jnp.mean(x.astype(jnp.float32), axis=(1, 2))
    return jnp.dot(pooled.astype(jnp.bfloat16), params["fc_w"],
                   preferred_element_type=jnp.float32) + params["fc_b"]


# ----------------------------------------------------------------------------
if __name__ == "__main__":
    key = jax.random.PRNGKey(0)
    pkey, xkey = jax.random.split(key)

    input_ch, output_ch = 3, 10
    # 32x32 RGB input: smallest size that survives ResNet50's /32 downsampling
    x = jax.random.normal(xkey, (2, input_ch, 32, 32), dtype=jnp.float32)
    params = init_resnet50(pkey, input_ch, output_ch)

    out = jax.block_until_ready(resnet50_forward(params, x))
    ref = jax.block_until_ready(ref_forward(params, x))

    assert out.shape == (2, output_ch), out.shape
    np.testing.assert_allclose(np.asarray(out), np.asarray(ref), rtol=4e-2, atol=4e-2)
    print("KERNEL_OK")
</pallas_src>

<mosaic_0001>
module attributes {stable_mosaic.version = 11 : i64} {
  func.func @kernel(%arg0: i32, %arg1: i32, %arg2: memref<1x256x147xbf16, #tpu.memory_space<vmem>>, %arg3: memref<1x147x64xbf16, #tpu.memory_space<vmem>>, %arg4: memref<1x64xf32, #tpu.memory_space<vmem>>, %arg5: memref<1x256x64xbf16, #tpu.memory_space<vmem>>) attributes {dimension_semantics = [#tpu.dimension_semantics<parallel>, #tpu.dimension_semantics<parallel>], iteration_bounds = array<i64: 1, 2>, scalar_prefetch = 0 : i64, scratch_operands = 0 : i64, tpu.core_type = #tpu.core_type<tc>, window_params = [{transform_indices = @transform_0, window_bounds = array<i64: 1, 256, 147>}, {transform_indices = @transform_1, window_bounds = array<i64: 1, 147, 64>}, {transform_indices = @transform_2, window_bounds = array<i64: 1, 64>}, {transform_indices = @transform_3, window_bounds = array<i64: 1, 256, 64>}]} {
    %c0 = arith.constant 0 : index
    %c0_0 = arith.constant 0 : index
    %c0_1 = arith.constant 0 : index
    %0 = vector.load %arg2[%c0, %c0_0, %c0_1] : memref<1x256x147xbf16, #tpu.memory_space<vmem>>, vector<1x256x147xbf16>
    %1 = vector.shape_cast %0 : vector<1x256x147xbf16> to vector<256x147xbf16>
    %c0_2 = arith.constant 0 : index
    %c0_3 = arith.constant 0 : index
    %c0_4 = arith.constant 0 : index
    %2 = vector.load %arg3[%c0_2, %c0_3, %c0_4] : memref<1x147x64xbf16, #tpu.memory_space<vmem>>, vector<1x147x64xbf16>
    %3 = vector.shape_cast %2 : vector<1x147x64xbf16> to vector<147x64xbf16>
    %cst = arith.constant dense<0.000000e+00> : vector<256x64xf32>
    %4 = tpu.matmul %1, %3, %cst {dimension_numbers = #tpu.dot_dimension_numbers<[1], [0], [0], [1], [0, 0, 1, 1], [], []>} : vector<256x147xbf16>, vector<147x64xbf16>, vector<256x64xf32> -> vector<256x64xf32>
    %c0_5 = arith.constant 0 : index
    %c0_6 = arith.constant 0 : index
    %5 = vector.load %arg4[%c0_5, %c0_6] : memref<1x64xf32, #tpu.memory_space<vmem>>, vector<1x64xf32>
    %6 = vector.broadcast %5 : vector<1x64xf32> to vector<256x64xf32>
    %7 = arith.addf %4, %6 : vector<256x64xf32>
    %cst_7 = arith.constant 0.000000e+00 : f32
    %8 = vector.broadcast %cst_7 : f32 to vector<256x64xf32>
    %9 = arith.maximumf %7, %8 : vector<256x64xf32>
    %10 = arith.truncf %9 : vector<256x64xf32> to vector<256x64xbf16>
    %c0_8 = arith.constant 0 : index
    %c0_9 = arith.constant 0 : index
    %c0_10 = arith.constant 0 : index
    %11 = vector.load %arg5[%c0_8, %c0_9, %c0_10] : memref<1x256x64xbf16, #tpu.memory_space<vmem>>, vector<1x256x64xbf16>
    %12 = vector.shape_cast %11 : vector<1x256x64xbf16> to vector<256x64xbf16>
    %13 = vector.shape_cast %10 : vector<256x64xbf16> to vector<1x256x64xbf16>
    tpu.vector_store %arg5[%c0_8, %c0_9, %c0_10], %13 {strides = array<i32>} : memref<1x256x64xbf16, #tpu.memory_space<vmem>>, vector<1x256x64xbf16>,
    return
  }
  func.func @transform_0(%arg0: i32, %arg1: i32) -> (i32, i32, i32) {
    %c0_i32 = arith.constant 0 : i32
    %c0_i32_0 = arith.constant 0 : i32
    %c0_i32_1 = arith.constant 0 : i32
    return %arg1, %c0_i32, %c0_i32_0 : i32, i32, i32
  }
  func.func @transform_1(%arg0: i32, %arg1: i32) -> (i32, i32, i32) {
    %c0_i32 = arith.constant 0 : i32
    %c0_i32_0 = arith.constant 0 : i32
    %c0_i32_1 = arith.constant 0 : i32
    return %c0_i32, %c0_i32_0, %arg0 : i32, i32, i32
  }
  func.func @transform_2(%arg0: i32, %arg1: i32) -> (i32, i32) {
    %c0_i32 = arith.constant 0 : i32
    %c0_i32_0 = arith.constant 0 : i32
    return %c0_i32, %arg0 : i32, i32
  }
  func.func @transform_3(%arg0: i32, %arg1: i32) -> (i32, i32, i32) {
    %c0_i32 = arith.constant 0 : i32
    %c0_i32_0 = arith.constant 0 : i32
    return %arg1, %c0_i32, %arg0 : i32, i32, i32
  }
}

</mosaic_0001>

<bundles_post_ra>
// kernel: tpu_custom_call.1
= control target key start
LH: loop header
LB: loop body
LE: loop exit
PB: predicated region body
PF: predicated region fallthrough
CT: control target
= control target key end

     0   :  { %s1285_s12 = smov 0   ;;  %s1287_s13 = smov 0   ;;  %s1505_s0 = inlined_call_operand.vmem [shape: bf16[2,256,147], index: 0, kind: input, shape index: {}]   ;;  %s1506_s1 = inlined_call_operand.vmem [shape: bf16[1,147,64], index: 1, kind: input, shape index: {}]   ;;  %s1507_s2 = inlined_call_operand.vmem [shape: f32[1,64], index: 2, kind: input, shape index: {}]   ;;  %s1508_s3 = inlined_call_operand.vmem [shape: bf16[2,256,64], index: 3, kind: output, shape index: {}]  }
   0x1   :  { %s1289_s14 = smov 0  }
   0x2 LB: > { %s22_s15 = sadd.s32 1, %s1257_s13  ;;  %p1003_p0 = scmp.ge.s32.totalorder %s1261_s14, 1  ;;  %s1261_s14 = sphi %s1289_s14, %s13_s14   ;;  %s1257_s13 = sphi %s1287_s13, %s1510_s13   ;;  %s1253_s12 = sphi %s1285_s12, %s1509_s12  }
   0x3   : > { %p23_p1 = scmp.ge.s32.totalorder %s22_s15, 2  ;;  %p168_p2 = scmp.lt.s32.totalorder %s1261_s14, 3 }
   0x5   : > { %s1512_s15 = smov (%p23_p1, %s22_s15), 0  ;;  %p169_p3 = pnand %p1003_p0, %p168_p2 }
   0x6   : > { %p202_p4 = scmp.lt.s32.totalorder (!%p169_p3), %s1253_s12, 1 }
   0x7   : > { %172 = sbr.rel (%p169_p3) target bundleno = 313 (0x139), region = 32 }
   0xc   : > { %v1181_v0 = vld [vmem:[%s1506_s1 + $0x38] sm:$0xff]   ;;  %v1263_v1 = vmov 0   ;;  %v1182_v2 = vld [vmem:[%s1506_s1 + $0x30] sm:$0xff]   ;;  %v1183_v3 = vld [vmem:[%s1506_s1 + $0x28] sm:$0xff]   ;;  %s1514_s12 = smov (!%p202_p4, %s1253_s12), 1  ;;  %vm482_vm0 = vcmask 154624  }
   0xd   : > { %538 = vmatprep.subr.bf16.mxu0 %v1263_v1  ;;  %1135 = vmatprep.subr.bf16.mxu1 %v1263_v1  ;;  %v1184_v4 = vld [vmem:[%s1506_s1 + $0x20] sm:$0xff]   ;;  %s1101_s24 = sshll.u32 %s1514_s12, 8  ;;  %v1185_v5 = vld [vmem:[%s1506_s1 + $0x18] sm:$0xff]   ;;  %v1186_v8 = vld [vmem:[%s1506_s1 + $0x10] sm:$0xff]   ;;  %vm531_vm1 = vcmask 1040384   ;;  %vm532_vm2 = vcmask 1041408  }
   0xe   : > { %539 = vmatpush1.bf16.msra.mxu0 %v1181_v0  ;;  %1145 = vmatpush1.bf16.msra.mxu1 %v1181_v0  ;;  %s1321_s27 = scalar_lea.vmem %s1505_s0, %s1101_s24  ;;  %v1187_v9 = vld [vmem:[%s1506_s1 + $0x8] sm:$0xff]   ;;  %v1264_v10 = vmov 65535   ;;  %v1188_v12 = vld [vmem:[%s1506_s1] sm:$0xff]   ;;  %s1102_s19 = sshll.u32 %s1514_s12, 7  ;;  %vm859_vm3 = vcmask 519168  }
   0xf   : > { %540 = vmatprep.subr.bf16.mxu0 %v1263_v1  ;;  %1136 = vmatprep.subr.bf16.mxu1 %v1263_v1  ;;  %v1193_v6 = vld [vmem:[%s1321_s27 + $0x4] ss:$8 sps:$4 sm:$0xff]   ;;  %v533_v11 = vsel %vm531_vm1, 4294967295, %v1264_v10  ;;  %v1189_v13 = vld [vmem:[%s1506_s1 + $0x48] ss:$0 sps:$4 sm:$0x33]   ;;  %s1400_s22 = scalar_lea.vmem %s1508_s3, %s1102_s19 }
  0x10   : > { %v1196_v7 = vld [vmem:[%s1321_s27 + $0x84] ss:$8 sps:$4 sm:$0xff]   ;;  %1051 = vmatprep.mubr.msk.bf16.mxu0 %vm482_vm0, %v1193_v6  ;;  %v534_v14 = vsel %vm532_vm2, %v533_v11, 0  ;;  %v1191_v17 = vld [vmem:[%s1321_s27] ss:$8 sps:$4 sm:$0xff]  }
  0x11   : > { %1059 = vmatprep.mubr.msk.bf16.mxu1 %vm482_vm0, %v1196_v7  ;;  %v536_v15 = vand.u32 %v1189_v13, %v534_v14  ;;  %v1190_v16 = vld [vmem:[%s1506_s1 + $0x40] sm:$0xff]   ;;  %v1197_v19 = vld [vmem:[%s1321_s27 + $0x14] ss:$8 sps:$4 sm:$0xff]   ;;  %v1201_v21 = vld [vmem:[%s1321_s27 + $0x10] ss:$8 sps:$4 sm:$0xff]  }
  0x12   : > { %541 = vmatpush1.bf16.msra.mxu0 %v1182_v2  ;;  %1146 = vmatpush1.bf16.msra.mxu1 %v1182_v2  ;;  %v1194_v18 = vld [vmem:[%s1321_s27 + $0x80] ss:$8 sps:$4 sm:$0xff]   ;;  %v1199_v20 = vld [vmem:[%s1321_s27 + $0x94] ss:$8 sps:$4 sm:$0xff]   ;;  %v1202_v22 = vld [vmem:[%s1321_s27 + $0x90] ss:$8 sps:$4 sm:$0xff]  }
  0x13   : > { %542 = vmatprep.subr.bf16.mxu0 %v1263_v1  ;;  %1137 = vmatprep.subr.bf16.mxu1 %v1263_v1  ;;  %v1203_v23 = vld [vmem:[%s1321_s27 + $0x24] ss:$8 sps:$4 sm:$0xff]   ;;  %v1207_v25 = vld [vmem:[%s1321_s27 + $0x20] ss:$8 sps:$4 sm:$0xff]   ;;  %v1209_v27 = vld [vmem:[%s1321_s27 + $0x34] ss:$8 sps:$4 sm:$0xff]  }
  0x14   : > { %v1205_v24 = vld [vmem:[%s1321_s27 + $0xa4] ss:$8 sps:$4 sm:$0xff]   ;;  %v1208_v26 = vld [vmem:[%s1321_s27 + $0xa0] ss:$8 sps:$4 sm:$0xff]   ;;  %v1211_v28 = vld [vmem:[%s1321_s27 + $0xb4] ss:$8 sps:$4 sm:$0xff]  }
  0x15   : > { %v1213_v29 = vld [vmem:[%s1321_s27 + $0x30] ss:$8 sps:$4 sm:$0xff]   ;;  %v1215_v31 = vld [vmem:[%s1321_s27 + $0x44] ss:$8 sps:$4 sm:$0xff]   ;;  %v1219_v33 = vld [vmem:[%s1321_s27 + $0x40] ss:$8 sps:$4 sm:$0xff]  }
  0x16   : > { %543 = vmatpush1.bf16.msra.mxu0 %v1183_v3  ;;  %1147 = vmatpush1.bf16.msra.mxu1 %v1183_v3  ;;  %v1214_v30 = vld [vmem:[%s1321_s27 + $0xb0] ss:$8 sps:$4 sm:$0xff]   ;;  %v1217_v32 = vld [vmem:[%s1321_s27 + $0xc4] ss:$8 sps:$4 sm:$0xff]   ;;  %v1220_v34 = vld [vmem:[%s1321_s27 + $0xc0] ss:$8 sps:$4 sm:$0xff]  }
  0x17   : > { %544 = vmatprep.subr.bf16.mxu0 %v1263_v1  ;;  %1138 = vmatprep.subr.bf16.mxu1 %v1263_v1  ;;  %v1221_v35 = vld [vmem:[%s1321_s27 + $0x54] ss:$8 sps:$4 sm:$0xff]   ;;  %v1225_v37 = vld [vmem:[%s1321_s27 + $0x50] ss:$8 sps:$4 sm:$0xff]   ;;  %v1227_v39 = vld [vmem:[%s1321_s27 + $0x64] ss:$8 sps:$4 sm:$0xff]  }
  0x18   : > { %v1223_v36 = vld [vmem:[%s1321_s27 + $0xd4] ss:$8 sps:$4 sm:$0xff]   ;;  %v1226_v38 = vld [vmem:[%s1321_s27 + $0xd0] ss:$8 sps:$4 sm:$0xff]   ;;  %v1229_v40 = vld [vmem:[%s1321_s27 + $0xe4] ss:$8 sps:$4 sm:$0xff]  }
  0x19   : > { %v1231_v41 = vld [vmem:[%s1321_s27 + $0x60] ss:$8 sps:$4 sm:$0xff]   ;;  %v1233_v43 = vld [vmem:[%s1321_s27 + $0x74] ss:$8 sps:$4 sm:$0xff]   ;;  %v1237_v45 = vld [vmem:[%s1321_s27 + $0x70] ss:$8 sps:$4 sm:$0xff]  }
  0x1a   : > { %545 = vmatpush1.bf16.msra.mxu0 %v1184_v4  ;;  %1148 = vmatpush1.bf16.msra.mxu1 %v1184_v4  ;;  %v1232_v42 = vld [vmem:[%s1321_s27 + $0xe0] ss:$8 sps:$4 sm:$0xff]   ;;  %v1235_v44 = vld [vmem:[%s1321_s27 + $0xf4] ss:$8 sps:$4 sm:$0xff]   ;;  %v1238_v46 = vld [vmem:[%s1321_s27 + $0xf0] ss:$8 sps:$4 sm:$0xff]  }
  0x1b   : > { %546 = vmatprep.subr.bf16.mxu0 %v1263_v1  ;;  %1139 = vmatprep.subr.bf16.mxu1 %v1263_v1  ;;  %v1392_v47 = vld [vmem:[%s1507_s2] ss:$0 sm:$0xff] }
  0x1e   : > { %547 = vmatpush1.bf16.msra.mxu0 %v1185_v5  ;;  %1149 = vmatpush1.bf16.msra.mxu1 %v1185_v5 }
  0x1f   : > { %548 = vmatprep.subr.bf16.mxu0 %v1263_v1  ;;  %1140 = vmatprep.subr.bf16.mxu1 %v1263_v1 }
  0x22   : > { %549 = vmatpush1.bf16.msra.mxu0 %v1186_v8  ;;  %1150 = vmatpush1.bf16.msra.mxu1 %v1186_v8 }
  0x23   : > { %550 = vmatprep.subr.bf16.mxu0 %v1263_v1  ;;  %1141 = vmatprep.subr.bf16.mxu1 %v1263_v1 }
  0x26   : > { %551 = vmatpush1.bf16.msra.mxu0 %v1187_v9  ;;  %1151 = vmatpush1.bf16.msra.mxu1 %v1187_v9 }
  0x27   : > { %552 = vmatprep.subr.bf16.mxu0 %v1263_v1  ;;  %1142 = vmatprep.subr.bf16.mxu1 %v1263_v1 }
  0x2a   : > { %553 = vmatpush1.bf16.msra.mxu0 %v1188_v12  ;;  %1152 = vmatpush1.bf16.msra.mxu1 %v1188_v12 }
  0x2b   : > { %566 = vmatprep.subr.bf16.mxu0 %v1263_v1  ;;  %1143 = vmatprep.subr.bf16.mxu1 %v1263_v1 }
  0x2e   : > { %567 = vmatpush2.bf16.msra.mxu0 %v536_v15  ;;  %1153 = vmatpush2.bf16.msra.mxu1 %v536_v15 }
  0x2f   : > { %568 = vmatprep.subr.bf16.mxu0 %v1263_v1  ;;  %1144 = vmatprep.subr.bf16.mxu1 %v1263_v1 }
  0x32   : > { %569 = vmatpush2.bf16.msra.mxu0 %v1190_v16  ;;  %1154 = vmatpush2.bf16.msra.mxu1 %v1190_v16 }
  0x35   : > { %571 = vmatmul.mubr.bf16.vlgmr.msra.gmra.mxu0 %v1191_v17  ;;  %635 = vmatmul.mubr.bf16.vlgmr.msra.gmra.mxu1 %v1194_v18 }
  0x36   : > { %1052 = vmatprep.mubr.msk.bf16.mxu0 %vm482_vm0, %v1197_v19  ;;  %1060 = vmatprep.mubr.msk.bf16.mxu1 %vm482_vm0, %v1199_v20 }
  0x3d   : > { %579 = vmatmul.mubr.bf16.gmra.mxu0 %v1201_v21  ;;  %643 = vmatmul.mubr.bf16.gmra.mxu1 %v1202_v22 }
  0x3e   : > { %1053 = vmatprep.mubr.msk.bf16.mxu0 %vm482_vm0, %v1203_v23  ;;  %1061 = vmatprep.mubr.msk.bf16.mxu1 %vm482_vm0, %v1205_v24 }
  0x45   : > { %587 = vmatmul.mubr.bf16.gmra.mxu0 %v1207_v25  ;;  %651 = vmatmul.mubr.bf16.gmra.mxu1 %v1208_v26 }
  0x46   : > { %1054 = vmatprep.mubr.msk.bf16.mxu0 %vm482_vm0, %v1209_v27  ;;  %1062 = vmatprep.mubr.msk.bf16.mxu1 %vm482_vm0, %v1211_v28 }
  0x4d   : > { %595 = vmatmul.mubr.bf16.gmra.mxu0 %v1213_v29  ;;  %659 = vmatmul.mubr.bf16.gmra.mxu1 %v1214_v30 }
  0x4e   : > { %1055 = vmatprep.mubr.msk.bf16.mxu0 %vm482_vm0, %v1215_v31  ;;  %1063 = vmatprep.mubr.msk.bf16.mxu1 %vm482_vm0, %v1217_v32 }
  0x55   : > { %603 = vmatmul.mubr.bf16.gmra.mxu0 %v1219_v33  ;;  %667 = vmatmul.mubr.bf16.gmra.mxu1 %v1220_v34 }
  0x56   : > { %1056 = vmatprep.mubr.msk.bf16.mxu0 %vm482_vm0, %v1221_v35  ;;  %1064 = vmatprep.mubr.msk.bf16.mxu1 %vm482_vm0, %v1223_v36 }
  0x5d   : > { %611 = vmatmul.mubr.bf16.gmra.mxu0 %v1225_v37  ;;  %675 = vmatmul.mubr.bf16.gmra.mxu1 %v1226_v38 }
  0x5e   : > { %1057 = vmatprep.mubr.msk.bf16.mxu0 %vm482_vm0, %v1227_v39  ;;  %1065 = vmatprep.mubr.msk.bf16.mxu1 %vm482_vm0, %v1229_v40 }
  0x65   : > { %619 = vmatmul.mubr.bf16.gmra.mxu0 %v1231_v41  ;;  %683 = vmatmul.mubr.bf16.gmra.mxu1 %v1232_v42 }
  0x66   : > { %1058 = vmatprep.mubr.msk.bf16.mxu0 %vm482_vm0, %v1233_v43  ;;  %1066 = vmatprep.mubr.msk.bf16.mxu1 %vm482_vm0, %v1235_v44 }
  0x6d   : > { %627 = vmatmul.mubr.bf16.gmra.mxu0 %v1237_v45  ;;  %691 = vmatmul.mubr.bf16.gmra.mxu1 %v1238_v46 }
  0xf5   : > { %v572_v48 = vpop.f32.mrf.mxu0  ;;  %v636_v49 = vpop.f32.mrf.mxu1 }
  0xf6   : > { %v573_v50 = vadd.f32 %v1392_v47, %v572_v48  ;;  %v637_v51 = vadd.f32 %v1392_v47, %v636_v49 }
  0xf7   : > { %v574_v52 = vpop.f32.mrf.mxu0  ;;  %v638_v53 = vpop.f32.mrf.mxu1 }
  0xf8   : > { %v699_v54 = vmax.f32 %v573_v50, 0.0  ;;  %v715_v55 = vmax.f32 %v637_v51, 0.0 }
  0xf9   : > { %v575_v56 = vpop.f32.mrf.mxu0  ;;  %v639_v57 = vpop.f32.mrf.mxu1 }
  0xfa   : > { %v1103_v58 = vpack.c.bf16 %v699_v54, %v699_v54  ;;  %v1119_v59 = vpack.c.bf16 %v715_v55, %v715_v55  ;;  %v576_v60 = vadd.f32 %v1392_v47, %v575_v56  ;;  %v640_v61 = vadd.f32 %v1392_v47, %v639_v57 }
  0xfb   : > { %v577_v62 = vpop.f32.mrf.mxu0  ;;  %v641_v63 = vpop.f32.mrf.mxu1 }
  0xfc   : > { %860 = vst.msk [vmem:[%s1400_s22] sm:$0xf] %vm859_vm3, %v1103_v58  ;;  %876 = vst.msk [vmem:[%s1400_s22 + $0x40] sm:$0xf] %vm859_vm3, %v1119_v59  ;;  %v700_v0 = vmax.f32 %v576_v60, 0.0  ;;  %v716_v1 = vmax.f32 %v640_v61, 0.0 }
  0xfd   : > { %v580_v2 = vpop.f32.mrf.mxu0  ;;  %v644_v3 = vpop.f32.mrf.mxu1 }
  0xfe   : > { %v1104_v4 = vpack.c.bf16 %v700_v0, %v700_v0  ;;  %v1120_v5 = vpack.c.bf16 %v716_v1, %v716_v1  ;;  %v581_v6 = vadd.f32 %v1392_v47, %v580_v2  ;;  %v645_v7 = vadd.f32 %v1392_v47, %v644_v3 }
  0xff   : > { %v582_v8 = vpop.f32.mrf.mxu0  ;;  %v646_v9 = vpop.f32.mrf.mxu1 }
 0x100   : > { %861 = vst.msk [vmem:[%s1400_s22 + $0x4] sm:$0xf] %vm859_vm3, %v1104_v4  ;;  %877 = vst.msk [vmem:[%s1400_s22 + $0x44] sm:$0xf] %vm859_vm3, %v1120_v5  ;;  %v701_v10 = vmax.f32 %v581_v6, 0.0  ;;  %v717_v11 = vmax.f32 %v645_v7, 0.0 }
 0x101   : > { %v583_v12 = vpop.f32.mrf.mxu0  ;;  %v647_v13 = vpop.f32.mrf.mxu1 }
 0x102   : > { %v1105_v14 = vpack.c.bf16 %v701_v10, %v701_v10  ;;  %v1121_v15 = vpack.c.bf16 %v717_v11, %v717_v11  ;;  %v584_v16 = vadd.f32 %v1392_v47, %v583_v12  ;;  %v648_v17 = vadd.f32 %v1392_v47, %v647_v13 }
 0x103   : > { %v585_v18 = vpop.f32.mrf.mxu0  ;;  %v649_v19 = vpop.f32.mrf.mxu1 }
 0x104   : > { %862 = vst.msk [vmem:[%s1400_s22 + $0x8] sm:$0xf] %vm859_vm3, %v1105_v14  ;;  %878 = vst.msk [vmem:[%s1400_s22 + $0x48] sm:$0xf] %vm859_vm3, %v1121_v15  ;;  %v702_v20 = vmax.f32 %v584_v16, 0.0  ;;  %v718_v21 = vmax.f32 %v648_v17, 0.0 }
 0x105   : > { %v588_v22 = vpop.f32.mrf.mxu0  ;;  %v652_v23 = vpop.f32.mrf.mxu1 }
 0x106   : > { %v1106_v24 = vpack.c.bf16 %v702_v20, %v702_v20  ;;  %v1122_v25 = vpack.c.bf16 %v718_v21, %v718_v21  ;;  %v589_v26 = vadd.f32 %v1392_v47, %v588_v22  ;;  %v653_v27 = vadd.f32 %v1392_v47, %v652_v23 }
 0x107   : > { %v590_v28 = vpop.f32.mrf.mxu0  ;;  %v654_v29 = vpop.f32.mrf.mxu1 }
 0x108   : > { %863 = vst.msk [vmem:[%s1400_s22 + $0xc] sm:$0xf] %vm859_vm3, %v1106_v24  ;;  %879 = vst.msk [vmem:[%s1400_s22 + $0x4c] sm:$0xf] %vm859_vm3, %v1122_v25  ;;  %v703_v30 = vmax.f32 %v589_v26, 0.0  ;;  %v719_v31 = vmax.f32 %v653_v27, 0.0 }
 0x109   : > { %v591_v32 = vpop.f32.mrf.mxu0  ;;  %v655_v33 = vpop.f32.mrf.mxu1 }
 0x10a   : > { %v1107_v34 = vpack.c.bf16 %v703_v30, %v703_v30  ;;  %v1123_v35 = vpack.c.bf16 %v719_v31, %v719_v31  ;;  %v592_v36 = vadd.f32 %v1392_v47, %v591_v32  ;;  %v656_v37 = vadd.f32 %v1392_v47, %v655_v33 }
 0x10b   : > { %v593_v38 = vpop.f32.mrf.mxu0  ;;  %v657_v39 = vpop.f32.mrf.mxu1 }
 0x10c   : > { %864 = vst.msk [vmem:[%s1400_s22 + $0x10] sm:$0xf] %vm859_vm3, %v1107_v34  ;;  %880 = vst.msk [vmem:[%s1400_s22 + $0x50] sm:$0xf] %vm859_vm3, %v1123_v35  ;;  %v704_v40 = vmax.f32 %v592_v36, 0.0  ;;  %v720_v41 = vmax.f32 %v656_v37, 0.0 }
 0x10d   : > { %v596_v42 = vpop.f32.mrf.mxu0  ;;  %v660_v43 = vpop.f32.mrf.mxu1 }
 0x10e   : > { %v1108_v44 = vpack.c.bf16 %v704_v40, %v704_v40  ;;  %v1124_v45 = vpack.c.bf16 %v720_v41, %v720_v41  ;;  %v597_v46 = vadd.f32 %v1392_v47, %v596_v42  ;;  %v661_v48 = vadd.f32 %v1392_v47, %v660_v43 }
 0x10f   : > { %v598_v49 = vpop.f32.mrf.mxu0  ;;  %v662_v50 = vpop.f32.mrf.mxu1 }
 0x110   : > { %865 = vst.msk [vmem:[%s1400_s22 + $0x14] sm:$0xf] %vm859_vm3, %v1108_v44  ;;  %881 = vst.msk [vmem:[%s1400_s22 + $0x54] sm:$0xf] %vm859_vm3, %v1124_v45  ;;  %v705_v51 = vmax.f32 %v597_v46, 0.0  ;;  %v721_v52 = vmax.f32 %v661_v48, 0.0 }
 0x111   : > { %v599_v53 = vpop.f32.mrf.mxu0  ;;  %v663_v54 = vpop.f32.mrf.mxu1 }
 0x112   : > { %v1109_v55 = vpack.c.bf16 %v705_v51, %v705_v51  ;;  %v1125_v56 = vpack.c.bf16 %v721_v52, %v721_v52  ;;  %v600_v57 = vadd.f32 %v1392_v47, %v599_v53  ;;  %v664_v58 = vadd.f32 %v1392_v47, %v663_v54 }
 0x113   : > { %v601_v59 = vpop.f32.mrf.mxu0  ;;  %v665_v60 = vpop.f32.mrf.mxu1 }
 0x114   : > { %866 = vst.msk [vmem:[%s1400_s22 + $0x18] sm:$0xf] %vm859_vm3, %v1109_v55  ;;  %882 = vst.msk [vmem:[%s1400_s22 + $0x58] sm:$0xf] %vm859_vm3, %v1125_v56  ;;  %v706_v61 = vmax.f32 %v600_v57, 0.0  ;;  %v722_v62 = vmax.f32 %v664_v58, 0.0 }
 0x115   : > { %v604_v63 = vpop.f32.mrf.mxu0  ;;  %v668_v0 = vpop.f32.mrf.mxu1 }
 0x116   : > { %v1110_v1 = vpack.c.bf16 %v706_v61, %v706_v61  ;;  %v1126_v2 = vpack.c.bf16 %v722_v62, %v722_v62  ;;  %v605_v3 = vadd.f32 %v1392_v47, %v604_v63  ;;  %v669_v4 = vadd.f32 %v1392_v47, %v668_v0 }
 0x117   : > { %v606_v5 = vpop.f32.mrf.mxu0  ;;  %v670_v6 = vpop.f32.mrf.mxu1 }
 0x118   : > { %867 = vst.msk [vmem:[%s1400_s22 + $0x1c] sm:$0xf] %vm859_vm3, %v1110_v1  ;;  %883 = vst.msk [vmem:[%s1400_s22 + $0x5c] sm:$0xf] %vm859_vm3, %v1126_v2  ;;  %v707_v7 = vmax.f32 %v605_v3, 0.0  ;;  %v723_v8 = vmax.f32 %v669_v4, 0.0 }
 0x119   : > { %v607_v9 = vpop.f32.mrf.mxu0  ;;  %v671_v10 = vpop.f32.mrf.mxu1 }
 0x11a   : > { %v1111_v11 = vpack.c.bf16 %v707_v7, %v707_v7  ;;  %v1127_v12 = vpack.c.bf16 %v723_v8, %v723_v8  ;;  %v608_v13 = vadd.f32 %v1392_v47, %v607_v9  ;;  %v672_v14 = vadd.f32 %v1392_v47, %v671_v10 }
 0x11b   : > { %v609_v15 = vpop.f32.mrf.mxu0  ;;  %v673_v16 = vpop.f32.mrf.mxu1 }
 0x11c   : > { %868 = vst.msk [vmem:[%s1400_s22 + $0x20] sm:$0xf] %vm859_vm3, %v1111_v11  ;;  %884 = vst.msk [vmem:[%s1400_s22 + $0x60] sm:$0xf] %vm859_vm3, %v1127_v12  ;;  %v708_v17 = vmax.f32 %v608_v13, 0.0  ;;  %v724_v18 = vmax.f32 %v672_v14, 0.0 }
 0x11d   : > { %v612_v19 = vpop.f32.mrf.mxu0  ;;  %v676_v20 = vpop.f32.mrf.mxu1 }
 0x11e   : > { %v1112_v21 = vpack.c.bf16 %v708_v17, %v708_v17  ;;  %v1128_v22 = vpack.c.bf16 %v724_v18, %v724_v18  ;;  %v613_v23 = vadd.f32 %v1392_v47, %v612_v19  ;;  %v677_v24 = vadd.f32 %v1392_v47, %v676_v20 }
 0x11f   : > { %v614_v25 = vpop.f32.mrf.mxu0  ;;  %v678_v26 = vpop.f32.mrf.mxu1 }
 0x120   : > { %869 = vst.msk [vmem:[%s1400_s22 + $0x24] sm:$0xf] %vm859_vm3, %v1112_v21  ;;  %885 = vst.msk [vmem:[%s1400_s22 + $0x64] sm:$0xf] %vm859_vm3, %v1128_v22  ;;  %v709_v27 = vmax.f32 %v613_v23, 0.0  ;;  %v725_v28 = vmax.f32 %v677_v24, 0.0 }
 0x121   : > { %v615_v29 = vpop.f32.mrf.mxu0  ;;  %v679_v30 = vpop.f32.mrf.mxu1 }
 0x122   : > { %v1113_v31 = vpack.c.bf16 %v709_v27, %v709_v27  ;;  %v1129_v32 = vpack.c.bf16 %v725_v28, %v725_v28  ;;  %v616_v33 = vadd.f32 %v1392_v47, %v615_v29  ;;  %v680_v34 = vadd.f32 %v1392_v47, %v679_v30 }
 0x123   : > { %v617_v35 = vpop.f32.mrf.mxu0  ;;  %v681_v36 = vpop.f32.mrf.mxu1 }
 0x124   : > { %870 = vst.msk [vmem:[%s1400_s22 + $0x28] sm:$0xf] %vm859_vm3, %v1113_v31  ;;  %886 = vst.msk [vmem:[%s1400_s22 + $0x68] sm:$0xf] %vm859_vm3, %v1129_v32  ;;  %v710_v37 = vmax.f32 %v616_v33, 0.0  ;;  %v726_v38 = vmax.f32 %v680_v34, 0.0 }
 0x125   : > { %v620_v39 = vpop.f32.mrf.mxu0  ;;  %v684_v40 = vpop.f32.mrf.mxu1 }
 0x126   : > { %v1114_v41 = vpack.c.bf16 %v710_v37, %v710_v37  ;;  %v1130_v42 = vpack.c.bf16 %v726_v38, %v726_v38  ;;  %v621_v43 = vadd.f32 %v1392_v47, %v620_v39  ;;  %v685_v44 = vadd.f32 %v1392_v47, %v684_v40 }
 0x127   : > { %v622_v45 = vpop.f32.mrf.mxu0  ;;  %v686_v46 = vpop.f32.mrf.mxu1 }
 0x128   : > { %871 = vst.msk [vmem:[%s1400_s22 + $0x2c] sm:$0xf] %vm859_vm3, %v1114_v41  ;;  %887 = vst.msk [vmem:[%s1400_s22 + $0x6c] sm:$0xf] %vm859_vm3, %v1130_v42  ;;  %v711_v48 = vmax.f32 %v621_v43, 0.0  ;;  %v727_v49 = vmax.f32 %v685_v44, 0.0 }
 0x129   : > { %v623_v50 = vpop.f32.mrf.mxu0  ;;  %v687_v51 = vpop.f32.mrf.mxu1 }
 0x12a   : > { %v1115_v52 = vpack.c.bf16 %v711_v48, %v711_v48  ;;  %v1131_v53 = vpack.c.bf16 %v727_v49, %v727_v49  ;;  %v624_v54 = vadd.f32 %v1392_v47, %v623_v50  ;;  %v688_v55 = vadd.f32 %v1392_v47, %v687_v51 }
 0x12b   : > { %v625_v56 = vpop.f32.mrf.mxu0  ;;  %v689_v57 = vpop.f32.mrf.mxu1 }
 0x12c   : > { %872 = vst.msk [vmem:[%s1400_s22 + $0x30] sm:$0xf] %vm859_vm3, %v1115_v52  ;;  %888 = vst.msk [vmem:[%s1400_s22 + $0x70] sm:$0xf] %vm859_vm3, %v1131_v53  ;;  %v712_v58 = vmax.f32 %v624_v54, 0.0  ;;  %v728_v59 = vmax.f32 %v688_v55, 0.0 }
 0x12d   : > { %v628_v60 = vpop.f32.mrf.mxu0  ;;  %v692_v61 = vpop.f32.mrf.mxu1 }
 0x12e   : > { %v1116_v62 = vpack.c.bf16 %v712_v58, %v712_v58  ;;  %v1132_v63 = vpack.c.bf16 %v728_v59, %v728_v59  ;;  %v629_v0 = vadd.f32 %v1392_v47, %v628_v60  ;;  %v693_v1 = vadd.f32 %v1392_v47, %v692_v61 }
 0x12f   : > { %v630_v2 = vpop.f32.mrf.mxu0  ;;  %v694_v3 = vpop.f32.mrf.mxu1 }
 0x130   : > { %873 = vst.msk [vmem:[%s1400_s22 + $0x34] sm:$0xf] %vm859_vm3, %v1116_v62  ;;  %889 = vst.msk [vmem:[%s1400_s22 + $0x74] sm:$0xf] %vm859_vm3, %v1132_v63  ;;  %v713_v4 = vmax.f32 %v629_v0, 0.0  ;;  %v729_v5 = vmax.f32 %v693_v1, 0.0 }
 0x131   : > { %v631_v6 = vpop.f32.mrf.mxu0  ;;  %v695_v7 = vpop.f32.mrf.mxu1 }
 0x132   : > { %v1117_v8 = vpack.c.bf16 %v713_v4, %v713_v4  ;;  %v1133_v9 = vpack.c.bf16 %v729_v5, %v729_v5  ;;  %v632_v10 = vadd.f32 %v1392_v47, %v631_v6  ;;  %v696_v11 = vadd.f32 %v1392_v47, %v695_v7 }
 0x133   : > { %v633_v12 = vpop.f32.mrf.mxu0  ;;  %v697_v13 = vpop.f32.mrf.mxu1 }
 0x134   : > { %874 = vst.msk [vmem:[%s1400_s22 + $0x38] sm:$0xf] %vm859_vm3, %v1117_v8  ;;  %890 = vst.msk [vmem:[%s1400_s22 + $0x78] sm:$0xf] %vm859_vm3, %v1133_v9  ;;  %v714_v14 = vmax.f32 %v632_v10, 0.0  ;;  %v730_v15 = vmax.f32 %v696_v11, 0.0 }
 0x136   : > { %v1118_v16 = vpack.c.bf16 %v714_v14, %v714_v14  ;;  %v1134_v17 = vpack.c.bf16 %v730_v15, %v730_v15 }
 0x138   : > { %875 = vst.msk [vmem:[%s1400_s22 + $0x3c] sm:$0xf] %vm859_vm3, %v1118_v16  ;;  %891 = vst.msk [vmem:[%s1400_s22 + $0x7c] sm:$0xf] %vm859_vm3, %v1134_v17 }
 0x139 PF: > { %s13_s14 = sadd.s32 1, %s1261_s14   ;;  %s1509_s12 = smov %s1257_s13 }
 0x13a   : > { %p10_p5 = scmp.ge.s32.totalorder %s13_s14, 4   ;;  %s1510_s13 = smov %s1512_s15 }
 0x13c   :  { %12 = sbr.rel (!%p10_p5) target bundleno = 2 (0x2), region = 68 }

</bundles_post_ra>
